<compile_context>
chip_gen: v7x
topology: tpu7x:2x2x1
jax: 0.10.0
libtpu: 0.0.40
codegen_flags: <defaults>
</compile_context>

<pallas_src>
import jax
import jax.numpy as jnp
from jax.experimental import pallas as pl
from jax.experimental.pallas import tpu as pltpu


def _pick_tile(n, cap, mult=8):
    """Largest t dividing n with t <= cap and (t % mult == 0 or t == n)."""
    cap = max(1, min(cap, n))
    for t in range(cap, 0, -1):
        if n % t == 0 and (t % mult == 0 or t == n):
            return t
    return n


# ----------------------------------------------------------------------------
# Kernel 1: conv-as-matmul + in-tile 2x2 maxpool + channel "concat" via static
#           column slices + per-split BN partial sums (accumulated over the
#           sequential grid axis).
# ----------------------------------------------------------------------------
def conv_pool_stats_kernel(patch_ref, w_ref, b_ref, y_ref, sum_ref, ssq_ref):
    cin = patch_ref.shape[1] // 9
    cconv = w_ref.shape[1]

    patches = patch_ref[...]                                 # (tm, 9*Cin)

    # conv branch (MXU): (tm, 9*Cin) @ (9*Cin, Cconv) + bias
    conv = jnp.dot(patches, w_ref[...],
                   preferred_element_type=jnp.float32) + b_ref[...]

    # pool branch (VPU): the 2x2 pool window is exactly taps 4,5,7,8 of the
    # 3x3 stride-2 conv window, so reuse the patch tile already in VMEM.
    p4 = patches[:, 4 * cin:5 * cin]
    p5 = patches[:, 5 * cin:6 * cin]
    p7 = patches[:, 7 * cin:8 * cin]
    p8 = patches[:, 8 * cin:9 * cin]
    pool = jnp.maximum(jnp.maximum(p4, p5), jnp.maximum(p7, p8))   # (tm, Cin)

    # channel concat via static column slices (no lane-axis concatenate)
    y_ref[:, :cconv] = conv
    y_ref[:, cconv:] = pool

    # BN partial statistics, accumulated across the "arbitrary" grid axis.
    @pl.when(pl.program_id(1) == 0)
    def _():
        sum_ref[...] = jnp.zeros_like(sum_ref)
        ssq_ref[...] = jnp.zeros_like(ssq_ref)

    sum_ref[0:1, :cconv] += jnp.sum(conv, axis=0, keepdims=True)
    sum_ref[0:1, cconv:] += jnp.sum(pool, axis=0, keepdims=True)
    ssq_ref[0:1, :cconv] += jnp.sum(conv * conv, axis=0, keepdims=True)
    ssq_ref[0:1, cconv:] += jnp.sum(pool * pool, axis=0, keepdims=True)


# ----------------------------------------------------------------------------
# Kernel 2: BatchNorm affine (precomputed per-channel scale/shift) + ReLU,
#           operating on a lane-dense (M/8, 8*Cout) view of y.
# ----------------------------------------------------------------------------
def bn_relu_kernel(y_ref, scale_ref, shift_ref, o_ref):
    o_ref[...] = jnp.maximum(y_ref[...] * scale_ref[...] + shift_ref[...], 0.0)


def downsampler_block(x, conv_w, conv_b, bn_gamma, bn_beta, *, eps=1e-3):
    """x: (N, Cin, H, W) float32 (NCHW).  Returns (N, Cout, H/2, W/2)."""
    N, Cin, H, W = x.shape
    Cconv = conv_w.shape[0]            # noutput - ninput
    Cout = Cconv + Cin                 # noutput
    Ho, Wo = H // 2, W // 2
    M = N * Ho * Wo
    assert H % 2 == 0 and W % 2 == 0
    assert M % 8 == 0, "N*(H//2)*(W//2) must be a multiple of 8"

    # ---- glue: NCHW -> NHWC, im2col patch extraction (data movement only) ----
    x_nhwc = jnp.transpose(x, (0, 2, 3, 1))                        # (N, H, W, Cin)
    xp = jnp.pad(x_nhwc, ((0, 0), (1, 1), (1, 1), (0, 0)))
    taps = [xp[:, dy:dy + 2 * Ho:2, dx:dx + 2 * Wo:2, :]
            for dy in range(3) for dx in range(3)]
    patches = jnp.stack(taps, axis=3).reshape(M, 9 * Cin)          # (M, 9*Cin)

    # conv weight (Cconv, Cin, 3, 3) -> (kh, kw, cin, cout) -> (9*Cin, Cconv)
    w_mat = jnp.transpose(conv_w, (2, 3, 1, 0)).reshape(9 * Cin, Cconv)
    b_mat = conv_b.reshape(1, Cconv)

    # ---- tiling: big row tiles, VMEM-budgeted (~2 MiB per patch buffer) ------
    tm = _pick_tile(M, cap=min(1024, max(8, (2 << 20) // (9 * Cin * 4))))
    nblocks = M // tm
    nsplit = 2 if (nblocks >= 2 and nblocks % 2 == 0) else 1   # v7x dual-TC split
    bps = nblocks // nsplit                                    # blocks per split

    # ---- Pallas kernel 1: conv matmul + pool max + BN partial sums -----------
    y, s, ss = pl.pallas_call(
        conv_pool_stats_kernel,
        out_shape=(
            jax.ShapeDtypeStruct((M, Cout), jnp.float32),
            jax.ShapeDtypeStruct((nsplit * 8, Cout), jnp.float32),
            jax.ShapeDtypeStruct((nsplit * 8, Cout), jnp.float32),
        ),
        grid_spec=pltpu.PrefetchScalarGridSpec(
            num_scalar_prefetch=0,
            grid=(nsplit, bps),
            in_specs=[
                pl.BlockSpec((tm, 9 * Cin), lambda c, i: (c * bps + i, 0)),
                pl.BlockSpec((9 * Cin, Cconv), lambda c, i: (0, 0)),
                pl.BlockSpec((1, Cconv), lambda c, i: (0, 0)),
            ],
            out_specs=[
                pl.BlockSpec((tm, Cout), lambda c, i: (c * bps + i, 0)),
                pl.BlockSpec((8, Cout), lambda c, i: (c, 0)),
                pl.BlockSpec((8, Cout), lambda c, i: (c, 0)),
            ],
        ),
        compiler_params=pltpu.CompilerParams(
            dimension_semantics=("parallel", "arbitrary")),
    )(patches, w_mat, b_mat)

    # ---- finalize per-channel BN stats (length-Cout math, negligible) --------
    s_tot = jnp.sum(s, axis=0)                    # reduce the per-split partials
    ss_tot = jnp.sum(ss, axis=0)
    mean = s_tot / M
    var = ss_tot / M - mean * mean                # biased var (PyTorch train BN)
    inv = jax.lax.rsqrt(var + eps)
    scale = (bn_gamma * inv).reshape(1, Cout)
    shift = (bn_beta - mean * bn_gamma * inv).reshape(1, Cout)

    # ---- Pallas kernel 2: lane-dense BN affine + ReLU (aliased in-place) -----
    pack = 8
    Mp = M // pack
    y_d = y.reshape(Mp, pack * Cout)              # contiguous view, no copy
    scale_d = jnp.tile(scale, (1, pack))          # (1, pack*Cout)
    shift_d = jnp.tile(shift, (1, pack))
    tr = _pick_tile(Mp, cap=min(1024, max(8, (2 << 20) // (pack * Cout * 4))))

    out_d = pl.pallas_call(
        bn_relu_kernel,
        out_shape=jax.ShapeDtypeStruct((Mp, pack * Cout), jnp.float32),
        grid_spec=pltpu.PrefetchScalarGridSpec(
            num_scalar_prefetch=0,
            grid=(Mp // tr,),
            in_specs=[
                pl.BlockSpec((tr, pack * Cout), lambda i: (i, 0)),
                pl.BlockSpec((1, pack * Cout), lambda i: (0, 0)),
                pl.BlockSpec((1, pack * Cout), lambda i: (0, 0)),
            ],
            out_specs=pl.BlockSpec((tr, pack * Cout), lambda i: (i, 0)),
        ),
        input_output_aliases={0: 0},              # y is dead after BN+ReLU
        compiler_params=pltpu.CompilerParams(
            dimension_semantics=("parallel",)),
    )(y_d, scale_d, shift_d)

    # Back to NCHW to match the PyTorch module's output layout.
    # TODO(synk): if the consumer is channels-last, return the NHWC tensor and
    #             skip this transpose (it is an extra HBM read+write).
    return jnp.transpose(out_d.reshape(N, Ho, Wo, Cout), (0, 3, 1, 2))


# ----------------------------------------------------------------------------
# Pure-JAX reference (mirrors the PyTorch forward in training mode)
# ----------------------------------------------------------------------------
def reference(x, conv_w, conv_b, gamma, beta, eps=1e-3):
    conv = jax.lax.conv_general_dilated(
        x, conv_w, window_strides=(2, 2), padding=((1, 1), (1, 1)),
        dimension_numbers=('NCHW', 'OIHW', 'NCHW')) + conv_b[None, :, None, None]
    pool = jax.lax.reduce_window(x, -jnp.inf, jax.lax.max,
                                 (1, 1, 2, 2), (1, 1, 2, 2), 'VALID')
    out = jnp.concatenate([conv, pool], axis=1)
    mean = out.mean(axis=(0, 2, 3), keepdims=True)
    var = out.var(axis=(0, 2, 3), keepdims=True)
    out = (out - mean) * jax.lax.rsqrt(var + eps)
    out = out * gamma[None, :, None, None] + beta[None, :, None, None]
    return jnp.maximum(out, 0.0)


if __name__ == "__main__":
    key = jax.random.PRNGKey(0)
    k_x, k_w, k_b, k_g, k_be = jax.random.split(key, 5)

    # DownsamplerBlock(ninput=4, noutput=16): conv has 16-4=12 output channels.
    N, Cin, H, W = 2, 4, 16, 16
    noutput = 16
    Cconv = noutput - Cin

    x = jax.random.normal(k_x, (N, Cin, H, W), dtype=jnp.float32)
    conv_w = 0.1 * jax.random.normal(k_w, (Cconv, Cin, 3, 3), dtype=jnp.float32)
    conv_b = 0.1 * jax.random.normal(k_b, (Cconv,), dtype=jnp.float32)
    bn_gamma = 1.0 + 0.1 * jax.random.normal(k_g, (noutput,), dtype=jnp.float32)
    bn_beta = 0.1 * jax.random.normal(k_be, (noutput,), dtype=jnp.float32)

    fn = jax.jit(downsampler_block)
    out = jax.block_until_ready(fn(x, conv_w, conv_b, bn_gamma, bn_beta))

    ref = reference(x, conv_w, conv_b, bn_gamma, bn_beta)
    assert out.shape == (N, noutput, H // 2, W // 2)
    err = float(jnp.max(jnp.abs(out - ref)))
    assert jnp.allclose(out, ref, atol=2e-2, rtol=2e-2), err

    print("KERNEL_OK")
</pallas_src>

<mosaic_0001>
module attributes {stable_mosaic.version = 11 : i64} {
  func.func @conv_pool_stats_kernel(%arg0: i32, %arg1: i32, %arg2: memref<128x36xf32, #tpu.memory_space<vmem>>, %arg3: memref<36x12xf32, #tpu.memory_space<vmem>>, %arg4: memref<1x12xf32, #tpu.memory_space<vmem>>, %arg5: memref<128x16xf32, #tpu.memory_space<vmem>>, %arg6: memref<8x16xf32, #tpu.memory_space<vmem>>, %arg7: memref<8x16xf32, #tpu.memory_space<vmem>>) attributes {dimension_semantics = [#tpu.dimension_semantics<parallel>, #tpu.dimension_semantics<arbitrary>], iteration_bounds = array<i64: 1, 1>, scalar_prefetch = 0 : i64, scratch_operands = 0 : i64, tpu.core_type = #tpu.core_type<tc>, window_params = [{transform_indices = @transform_0, window_bounds = array<i64: 128, 36>}, {pipeline_mode = #tpu.pipeline_mode<synchronous>, transform_indices = @transform_1, window_bounds = array<i64: 36, 12>}, {pipeline_mode = #tpu.pipeline_mode<synchronous>, transform_indices = @transform_2, window_bounds = array<i64: 1, 12>}, {transform_indices = @transform_3, window_bounds = array<i64: 128, 16>}, {transform_indices = @transform_4, window_bounds = array<i64: 8, 16>}, {transform_indices = @transform_5, window_bounds = array<i64: 8, 16>}]} {
    %c0 = arith.constant 0 : index
    %c0_0 = arith.constant 0 : index
    %0 = vector.load %arg2[%c0, %c0_0] : memref<128x36xf32, #tpu.memory_space<vmem>>, vector<128x36xf32>
    %c0_1 = arith.constant 0 : index
    %c0_2 = arith.constant 0 : index
    %1 = vector.load %arg3[%c0_1, %c0_2] : memref<36x12xf32, #tpu.memory_space<vmem>>, vector<36x12xf32>
    %cst = arith.constant dense<0.000000e+00> : vector<128x12xf32>
    %2 = tpu.matmul %0, %1, %cst {dimension_numbers = #tpu.dot_dimension_numbers<[1], [0], [0], [1], [0, 0, 1, 1], [], []>} : vector<128x36xf32>, vector<36x12xf32>, vector<128x12xf32> -> vector<128x12xf32>
    %c0_3 = arith.constant 0 : index
    %c0_4 = arith.constant 0 : index
    %3 = vector.load %arg4[%c0_3, %c0_4] : memref<1x12xf32, #tpu.memory_space<vmem>>, vector<1x12xf32>
    %4 = vector.broadcast %3 : vector<1x12xf32> to vector<128x12xf32>
    %5 = arith.addf %2, %4 : vector<128x12xf32>
    %6 = vector.extract_strided_slice %0 {offsets = [0, 16], sizes = [128, 4], strides = [1, 1]} : vector<128x36xf32> to vector<128x4xf32>
    %7 = vector.extract_strided_slice %0 {offsets = [0, 20], sizes = [128, 4], strides = [1, 1]} : vector<128x36xf32> to vector<128x4xf32>
    %8 = vector.extract_strided_slice %0 {offsets = [0, 28], sizes = [128, 4], strides = [1, 1]} : vector<128x36xf32> to vector<128x4xf32>
    %9 = vector.extract_strided_slice %0 {offsets = [0, 32], sizes = [128, 4], strides = [1, 1]} : vector<128x36xf32> to vector<128x4xf32>
    %10 = arith.maximumf %6, %7 : vector<128x4xf32>
    %11 = arith.maximumf %8, %9 : vector<128x4xf32>
    %12 = arith.maximumf %10, %11 : vector<128x4xf32>
    %c0_5 = arith.constant 0 : index
    %c0_6 = arith.constant 0 : index
    %13 = vector.load %arg5[%c0_5, %c0_6] : memref<128x16xf32, #tpu.memory_space<vmem>>, vector<128x12xf32>
    tpu.vector_store %arg5[%c0_5, %c0_6], %5 {strides = array<i32>} : memref<128x16xf32, #tpu.memory_space<vmem>>, vector<128x12xf32>,
    %c0_7 = arith.constant 0 : index
    %c12 = arith.constant 12 : index
    %14 = vector.load %arg5[%c0_7, %c12] : memref<128x16xf32, #tpu.memory_space<vmem>>, vector<128x4xf32>
    tpu.vector_store %arg5[%c0_7, %c12], %12 {strides = array<i32>} : memref<128x16xf32, #tpu.memory_space<vmem>>, vector<128x4xf32>,
    %c0_i32 = arith.constant 0 : i32
    %15 = arith.cmpi eq, %arg1, %c0_i32 : i32
    %16 = arith.extui %15 : i1 to i32
    %c0_i32_8 = arith.constant 0 : i32
    %17 = arith.cmpi ne, %16, %c0_i32_8 : i32
    scf.if %17 {
      %cst_29 = arith.constant 0.000000e+00 : f32
      %40 = vector.broadcast %cst_29 : f32 to vector<8x16xf32>
      %c0_30 = arith.constant 0 : index
      %c0_31 = arith.constant 0 : index
      %41 = vector.load %arg6[%c0_30, %c0_31] : memref<8x16xf32, #tpu.memory_space<vmem>>, vector<8x16xf32>
      tpu.vector_store %arg6[%c0_30, %c0_31], %40 {strides = array<i32>} : memref<8x16xf32, #tpu.memory_space<vmem>>, vector<8x16xf32>,
      %cst_32 = arith.constant 0.000000e+00 : f32
      %42 = vector.broadcast %cst_32 : f32 to vector<8x16xf32>
      %c0_33 = arith.constant 0 : index
      %c0_34 = arith.constant 0 : index
      %43 = vector.load %arg7[%c0_33, %c0_34] : memref<8x16xf32, #tpu.memory_space<vmem>>, vector<8x16xf32>
      tpu.vector_store %arg7[%c0_33, %c0_34], %42 {strides = array<i32>} : memref<8x16xf32, #tpu.memory_space<vmem>>, vector<8x16xf32>,
    } else {
    }
    %c0_9 = arith.constant 0 : index
    %c0_10 = arith.constant 0 : index
    %18 = vector.load %arg6[%c0_9, %c0_10] : memref<8x16xf32, #tpu.memory_space<vmem>>, vector<1x12xf32>
    %cst_11 = arith.constant dense<0.000000e+00> : vector<12xf32>
    %19 = vector.multi_reduction <add>, %5, %cst_11 [0] : vector<128x12xf32> to vector<12xf32>
    %20 = vector.shape_cast %19 : vector<12xf32> to vector<1x12xf32>
    %21 = arith.addf %18, %20 : vector<1x12xf32>
    %c0_12 = arith.constant 0 : index
    %c0_13 = arith.constant 0 : index
    %22 = vector.load %arg6[%c0_12, %c0_13] : memref<8x16xf32, #tpu.memory_space<vmem>>, vector<1x12xf32>
    tpu.vector_store %arg6[%c0_12, %c0_13], %21 {strides = array<i32>} : memref<8x16xf32, #tpu.memory_space<vmem>>, vector<1x12xf32>,
    %c0_14 = arith.constant 0 : index
    %c12_15 = arith.constant 12 : index
    %23 = vector.load %arg6[%c0_14, %c12_15] : memref<8x16xf32, #tpu.memory_space<vmem>>, vector<1x4xf32>
    %cst_16 = arith.constant dense<0.000000e+00> : vector<4xf32>
    %24 = vector.multi_reduction <add>, %12, %cst_16 [0] : vector<128x4xf32> to vector<4xf32>
    %25 = vector.shape_cast %24 : vector<4xf32> to vector<1x4xf32>
    %26 = arith.addf %23, %25 : vector<1x4xf32>
    %c0_17 = arith.constant 0 : index
    %c12_18 = arith.constant 12 : index
    %27 = vector.load %arg6[%c0_17, %c12_18] : memref<8x16xf32, #tpu.memory_space<vmem>>, vector<1x4xf32>
    tpu.vector_store %arg6[%c0_17, %c12_18], %26 {strides = array<i32>} : memref<8x16xf32, #tpu.memory_space<vmem>>, vector<1x4xf32>,
    %c0_19 = arith.constant 0 : index
    %c0_20 = arith.constant 0 : index
    %28 = vector.load %arg7[%c0_19, %c0_20] : memref<8x16xf32, #tpu.memory_space<vmem>>, vector<1x12xf32>
    %29 = arith.mulf %5, %5 : vector<128x12xf32>
    %cst_21 = arith.constant dense<0.000000e+00> : vector<12xf32>
    %30 = vector.multi_reduction <add>, %29, %cst_21 [0] : vector<128x12xf32> to vector<12xf32>
    %31 = vector.shape_cast %30 : vector<12xf32> to vector<1x12xf32>
    %32 = arith.addf %28, %31 : vector<1x12xf32>
    %c0_22 = arith.constant 0 : index
    %c0_23 = arith.constant 0 : index
    %33 = vector.load %arg7[%c0_22, %c0_23] : memref<8x16xf32, #tpu.memory_space<vmem>>, vector<1x12xf32>
    tpu.vector_store %arg7[%c0_22, %c0_23], %32 {strides = array<i32>} : memref<8x16xf32, #tpu.memory_space<vmem>>, vector<1x12xf32>,
    %c0_24 = arith.constant 0 : index
    %c12_25 = arith.constant 12 : index
    %34 = vector.load %arg7[%c0_24, %c12_25] : memref<8x16xf32, #tpu.memory_space<vmem>>, vector<1x4xf32>
    %35 = arith.mulf %12, %12 : vector<128x4xf32>
    %cst_26 = arith.constant dense<0.000000e+00> : vector<4xf32>
    %36 = vector.multi_reduction <add>, %35, %cst_26 [0] : vector<128x4xf32> to vector<4xf32>
    %37 = vector.shape_cast %36 : vector<4xf32> to vector<1x4xf32>
    %38 = arith.addf %34, %37 : vector<1x4xf32>
    %c0_27 = arith.constant 0 : index
    %c12_28 = arith.constant 12 : index
    %39 = vector.load %arg7[%c0_27, %c12_28] : memref<8x16xf32, #tpu.memory_space<vmem>>, vector<1x4xf32>
    tpu.vector_store %arg7[%c0_27, %c12_28], %38 {strides = array<i32>} : memref<8x16xf32, #tpu.memory_space<vmem>>, vector<1x4xf32>,
    return
  }
  func.func @transform_0(%arg0: i32, %arg1: i32) -> (i32, i32) {
    %c1_i32 = arith.constant 1 : i32
    %0 = arith.muli %arg0, %c1_i32 : i32
    %1 = arith.addi %0, %arg1 : i32
    %c0_i32 = arith.constant 0 : i32
    %c0_i32_0 = arith.constant 0 : i32
    return %1, %c0_i32 : i32, i32
  }
  func.func @transform_1(%arg0: i32, %arg1: i32) -> (i32, i32) {
    %c0_i32 = arith.constant 0 : i32
    %c0_i32_0 = arith.constant 0 : i32
    %c0_i32_1 = arith.constant 0 : i32
    return %c0_i32, %c0_i32_0 : i32, i32
  }
  func.func @transform_2(%arg0: i32, %arg1: i32) -> (i32, i32) {
    %c0_i32 = arith.constant 0 : i32
    %c0_i32_0 = arith.constant 0 : i32
    %c0_i32_1 = arith.constant 0 : i32
    return %c0_i32, %c0_i32_0 : i32, i32
  }
  func.func @transform_3(%arg0: i32, %arg1: i32) -> (i32, i32) {
    %c1_i32 = arith.constant 1 : i32
    %0 = arith.muli %arg0, %c1_i32 : i32
    %1 = arith.addi %0, %arg1 : i32
    %c0_i32 = arith.constant 0 : i32
    %c0_i32_0 = arith.constant 0 : i32
    return %1, %c0_i32 : i32, i32
  }
  func.func @transform_4(%arg0: i32, %arg1: i32) -> (i32, i32) {
    %c0_i32 = arith.constant 0 : i32
    %c0_i32_0 = arith.constant 0 : i32
    return %arg0, %c0_i32 : i32, i32
  }
  func.func @transform_5(%arg0: i32, %arg1: i32) -> (i32, i32) {
    %c0_i32 = arith.constant 0 : i32
    %c0_i32_0 = arith.constant 0 : i32
    return %arg0, %c0_i32 : i32, i32
  }
}

module attributes {stable_mosaic.version = 11 : i64} {
  func.func @bn_relu_kernel(%arg0: i32, %arg1: memref<16x128xf32, #tpu.memory_space<vmem>>, %arg2: memref<1x128xf32, #tpu.memory_space<vmem>>, %arg3: memref<1x128xf32, #tpu.memory_space<vmem>>, %arg4: memref<16x128xf32, #tpu.memory_space<vmem>>) attributes {dimension_semantics = [#tpu.dimension_semantics<parallel>], iteration_bounds = array<i64: 1>, scalar_prefetch = 0 : i64, scratch_operands = 0 : i64, tpu.core_type = #tpu.core_type<tc>, window_params = [{transform_indices = @transform_0, window_bounds = array<i64: 16, 128>}, {pipeline_mode = #tpu.pipeline_mode<synchronous>, transform_indices = @transform_1, window_bounds = array<i64: 1, 128>}, {pipeline_mode = #tpu.pipeline_mode<synchronous>, transform_indices = @transform_2, window_bounds = array<i64: 1, 128>}, {transform_indices = @transform_3, window_bounds = array<i64: 16, 128>}]} {
    %c0 = arith.constant 0 : index
    %c0_0 = arith.constant 0 : index
    %0 = vector.load %arg1[%c0, %c0_0] : memref<16x128xf32, #tpu.memory_space<vmem>>, vector<16x128xf32>
    %c0_1 = arith.constant 0 : index
    %c0_2 = arith.constant 0 : index
    %1 = vector.load %arg2[%c0_1, %c0_2] : memref<1x128xf32, #tpu.memory_space<vmem>>, vector<1x128xf32>
    %2 = vector.broadcast %1 : vector<1x128xf32> to vector<16x128xf32>
    %3 = arith.mulf %0, %2 : vector<16x128xf32>
    %c0_3 = arith.constant 0 : index
    %c0_4 = arith.constant 0 : index
    %4 = vector.load %arg3[%c0_3, %c0_4] : memref<1x128xf32, #tpu.memory_space<vmem>>, vector<1x128xf32>
    %5 = vector.broadcast %4 : vector<1x128xf32> to vector<16x128xf32>
    %6 = arith.addf %3, %5 : vector<16x128xf32>
    %cst = arith.constant 0.000000e+00 : f32
    %7 = vector.broadcast %cst : f32 to vector<16x128xf32>
    %8 = arith.maximumf %6, %7 : vector<16x128xf32>
    %c0_5 = arith.constant 0 : index
    %c0_6 = arith.constant 0 : index
    %9 = vector.load %arg4[%c0_5, %c0_6] : memref<16x128xf32, #tpu.memory_space<vmem>>, vector<16x128xf32>
    tpu.vector_store %arg4[%c0_5, %c0_6], %8 {strides = array<i32>} : memref<16x128xf32, #tpu.memory_space<vmem>>, vector<16x128xf32>,
    return
  }
  func.func @transform_0(%arg0: i32) -> (i32, i32) {
    %c0_i32 = arith.constant 0 : i32
    %c0_i32_0 = arith.constant 0 : i32
    return %arg0, %c0_i32 : i32, i32
  }
  func.func @transform_1(%arg0: i32) -> (i32, i32) {
    %c0_i32 = arith.constant 0 : i32
    %c0_i32_0 = arith.constant 0 : i32
    %c0_i32_1 = arith.constant 0 : i32
    return %c0_i32, %c0_i32_0 : i32, i32
  }
  func.func @transform_2(%arg0: i32) -> (i32, i32) {
    %c0_i32 = arith.constant 0 : i32
    %c0_i32_0 = arith.constant 0 : i32
    %c0_i32_1 = arith.constant 0 : i32
    return %c0_i32, %c0_i32_0 : i32, i32
  }
  func.func @transform_3(%arg0: i32) -> (i32, i32) {
    %c0_i32 = arith.constant 0 : i32
    %c0_i32_0 = arith.constant 0 : i32
    return %arg0, %c0_i32 : i32, i32
  }
}

</mosaic_0001>

<bundles_post_ra>
// kernel: downsampler_block.3
= control target key start
LH: loop header
LB: loop body
LE: loop exit
PB: predicated region body
PF: predicated region fallthrough
CT: control target
= control target key end

     0   :  { %s82_s0 = inlined_call_operand.vmem [shape: f32[16,128], index: 0, kind: input, shape index: {}, may-alias: {0,3}]   ;;  %s83_s1 = inlined_call_operand.vmem [shape: f32[1,128], index: 1, kind: input, shape index: {}]   ;;  %s84_s2 = inlined_call_operand.vmem [shape: f32[1,128], index: 2, kind: input, shape index: {}]   ;;  %s85_s3 = inlined_call_operand.vmem [shape: f32[16,128], index: 3, kind: output, shape index: {}, may-alias: {0,3}]  }
   0x1   :  { %v14_v0 = vld [vmem:[%s82_s0] sm:$0xff]  ;;  %v15_v4 = vld [vmem:[%s82_s0 + $0x8] sm:$0xff] }
   0x2   :  { %v42_v1 = vld [vmem:[%s83_s1] ss:$0 sm:$0xff] }
   0x3   :  { %v43_v2 = vld [vmem:[%s84_s2] ss:$0 sm:$0xff]  ;;  %v23_v3 = vmul.f32 %v42_v1, %v14_v0  ;;  %v24_v5 = vmul.f32 %v42_v1, %v15_v4 }
   0x5   :  { %v32_v6 = vadd.f32 %v43_v2, %v23_v3  ;;  %v33_v7 = vadd.f32 %v43_v2, %v24_v5 }
   0x7   :  { %v34_v8 = vmax.f32 %v32_v6, 0.0  ;;  %v35_v9 = vmax.f32 %v33_v7, 0.0 }
   0x9   :  { %36 = vst [vmem:[%s85_s3] sm:$0xff] %v34_v8  ;;  %37 = vst [vmem:[%s85_s3 + $0x8] sm:$0xff] %v35_v9 }

// kernel: downsampler_block.2
= control target key start
LH: loop header
LB: loop body
LE: loop exit
PB: predicated region body
PF: predicated region fallthrough
CT: control target
= control target key end

     0   :  { %vm81_vm0 = vcmask 293888   ;;  %s861_s22 = smov 124   ;;  %vm130_vm1 = vcmask 1043456   ;;  %vm423_vm2 = vcmask 97280   ;;  %vm570_vm3 = vcmask 162944   ;;  %s1433_s0 = inlined_call_operand.vmem [shape: f32[128,36], index: 0, kind: input, shape index: {}]   ;;  %s1434_s1 = inlined_call_operand.vmem [shape: f32[36,12], index: 1, kind: input, shape index: {}]   ;;  %s1435_s2 = inlined_call_operand.vmem [shape: f32[1,12], index: 2, kind: input, shape index: {}]   ;;  %s1436_s3 = inlined_call_operand.vmem [shape: f32[128,16], index: 3, kind: output, shape index: {0}]   ;;  %s1437_s4 = inlined_call_operand.vmem [shape: f32[8,16], index: 4, kind: output, shape index: {1}]   ;;  %s1438_s5 = inlined_call_operand.vmem [shape: f32[8,16], index: 5, kind: output, shape index: {2}]  }
   0x1   :  { %v897_v0 = vld [vmem:[%s1433_s0] sm:$0xff]  ;;  %v902_v1 = vld [vmem:[%s1433_s0 + $0x10] sm:$0xff]  ;;  %v911_v2 = vld [vmem:[%s1433_s0 + $0x8] sm:$0xff]  ;;  %vm525_vm4 = vcmask 130048   ;;  %vm567_vm5 = vcmask 90112   ;;  %vm504_vm6 = vcmask 130144  }
   0x2   :  { %279 = vrot.lane.b32.xlu0 %v897_v0, %s861_s22  ;;  %283 = vrot.lane.b32.xlu1 %v902_v1, %s861_s22  ;;  %v916_v3 = vld [vmem:[%s1433_s0 + $0x18] sm:$0xff]  ;;  %v923_v4 = vld [vmem:[%s1433_s0 + $0x40] sm:$0xff]  ;;  %vm613_vm7 = vcmask 122976  }
   0x3   :  { %820 = vmatprep.mubr.msk.f32.mxu0 %vm81_vm0, %v897_v0  ;;  %832 = vmatprep.mubr.msk.f32.mxu1 %vm81_vm0, %v923_v4  ;;  %v934_v5 = vld [vmem:[%s1433_s0 + $0x20] sm:$0xff]  ;;  %v939_v6 = vld [vmem:[%s1433_s0 + $0x28] sm:$0xff]  ;;  %v71_v9 = vld [vmem:[%s1434_s1 + $0x10] sm:$0xff] }
   0x4   :  { %v69_v7 = vld [vmem:[%s1434_s1] sm:$0xff]  ;;  %v70_v8 = vld [vmem:[%s1434_s1 + $0x8] sm:$0xff]  ;;  %v72_v11 = vld [vmem:[%s1434_s1 + $0x18] sm:$0xff] }
   0x5   :  { %v844_v10 = vpack.c.bf16 %v70_v8, %v69_v7  ;;  %v848_v12 = vpack.c.bf16 %v72_v11, %v71_v9  ;;  %v960_v13 = vld [vmem:[%s1433_s0 + $0x30] sm:$0xff]  ;;  %v965_v14 = vld [vmem:[%s1433_s0 + $0x38] sm:$0xff]  ;;  %v73_v15 = vld [vmem:[%s1434_s1 + $0x20] sm:$0xf] }
   0x6   :  { %281 = vrot.lane.b32.xlu0 %v911_v2, %s861_s22  ;;  %285 = vrot.lane.b32.xlu1 %v916_v3, %s861_s22  ;;  %v977_v16 = vld [vmem:[%s1433_s0 + $0x48] sm:$0xff]  ;;  %v63_v17 = vld [vmem:[%s1433_s0 + $0x50] sm:$0xff] }
   0x7   :  { %845 = vmatprep.subr.bf16.mxu0 %v844_v10  ;;  %852 = vmatprep.subr.bf16.mxu1 %v844_v10  ;;  %v64_v18 = vld [vmem:[%s1433_s0 + $0x58] sm:$0xff]  ;;  %v65_v19 = vld [vmem:[%s1433_s0 + $0x60] sm:$0xff]  ;;  %v66_v20 = vld [vmem:[%s1433_s0 + $0x68] sm:$0xff] }
   0x8   :  { %847 = vmatpush3.bf16.msra.mxu0 %v844_v10  ;;  %855 = vmatpush3.bf16.msra.mxu1 %v844_v10  ;;  %v67_v21 = vld [vmem:[%s1433_s0 + $0x70] sm:$0xff]  ;;  %v68_v22 = vld [vmem:[%s1433_s0 + $0x78] sm:$0xff]  ;;  %s862_s0 = smov 116   ;;  %v1103_v55 = vld [vmem:[%s1435_s2] ss:$0 sm:$0xff] }
   0x9   :  { %849 = vmatprep.subr.bf16.mxu0 %v848_v12  ;;  %853 = vmatprep.subr.bf16.mxu1 %v848_v12 }
   0xa   :  { %287 = vrot.lane.b32.xlu0 %v934_v5, %s861_s22  ;;  %289 = vrot.lane.b32.xlu1 %v939_v6, %s861_s22 }
   0xc   :  { %851 = vmatpush3.bf16.msra.mxu0 %v848_v12  ;;  %856 = vmatpush3.bf16.msra.mxu1 %v848_v12 }
   0xd   :  { %818 = vmatprep.subr.msk.mxu0 %vm130_vm1, %v73_v15  ;;  %854 = vmatprep.subr.msk.mxu1 %vm130_vm1, %v73_v15 }
   0xe   :  { %291 = vrot.lane.b32.xlu0 %v960_v13, %s861_s22  ;;  %293 = vrot.lane.b32.xlu1 %v965_v14, %s861_s22 }
  0x10   :  { %819 = vmatpush3.msk.msra.mxu0 %vm130_vm1, %v73_v15  ;;  %857 = vmatpush3.msk.msra.mxu1 %vm130_vm1, %v73_v15 }
  0x11   :  { %821 = vmatmul.mubr.msk.f32.vlgmr.msra.gmra.mrb[0].mxu0 %vm81_vm0, %v911_v2  ;;  %833 = vmatmul.mubr.msk.f32.vlgmr.msra.gmra.mrb[0].mxu1 %vm81_vm0, %v977_v16 }
  0x12   :  { %295 = vrot.lane.b32.xlu0 %v923_v4, %s861_s22  ;;  %297 = vrot.lane.b32.xlu1 %v977_v16, %s861_s22 }
  0x13   :  { %823 = vmatprep.mubr.msk.f32.mxu0 %vm81_vm0, %v902_v1  ;;  %835 = vmatprep.mubr.msk.f32.mxu1 %vm81_vm0, %v63_v17 }
  0x15   :  { %824 = vmatmul.mubr.msk.f32.gmra.mrb[2].mxu0 %vm81_vm0, %v916_v3  ;;  %836 = vmatmul.mubr.msk.f32.gmra.mrb[2].mxu1 %vm81_vm0, %v64_v18 }
  0x16   :  { %299 = vrot.lane.b32.xlu0 %v63_v17, %s861_s22  ;;  %301 = vrot.lane.b32.xlu1 %v64_v18, %s861_s22 }
  0x17   :  { %826 = vmatprep.mubr.msk.f32.mxu0 %vm81_vm0, %v934_v5  ;;  %838 = vmatprep.mubr.msk.f32.mxu1 %vm81_vm0, %v65_v19 }
  0x19   :  { %827 = vmatmul.mubr.msk.f32.gmra.mrb[4].mxu0 %vm81_vm0, %v939_v6  ;;  %839 = vmatmul.mubr.msk.f32.gmra.mrb[4].mxu1 %vm81_vm0, %v66_v20 }
  0x1a   :  { %303 = vrot.lane.b32.xlu0 %v65_v19, %s861_s22  ;;  %305 = vrot.lane.b32.xlu1 %v66_v20, %s861_s22 }
  0x1b   :  { %829 = vmatprep.mubr.msk.f32.mxu0 %vm81_vm0, %v960_v13  ;;  %841 = vmatprep.mubr.msk.f32.mxu1 %vm81_vm0, %v67_v21 }
  0x1d   :  { %830 = vmatmul.mubr.msk.f32.gmra.mrb[6].mxu0 %vm81_vm0, %v965_v14  ;;  %842 = vmatmul.mubr.msk.f32.gmra.mrb[6].mxu1 %vm81_vm0, %v68_v22 }
  0x1e   :  { %307 = vrot.lane.b32.xlu0 %v67_v21, %s861_s22  ;;  %309 = vrot.lane.b32.xlu1 %v68_v22, %s861_s22 }
  0x74   :  { %v280_v23 = vpop.permute.xlu0 %279  ;;  %v284_v24 = vpop.permute.xlu1 %283 }
  0x75   :  { %v327_v25 = vmax.f32 %v897_v0, %v280_v23  ;;  %v1032_v26 = vmax.f32 %v902_v1, %v284_v24 }
  0x77   :  { %359 = vrot.lane.b32.xlu0 %v327_v25, %s862_s0 }
  0x78   :  { %v282_v27 = vpop.permute.xlu0 %281  ;;  %v286_v28 = vpop.permute.xlu1 %285 }
  0x79   :  { %v1035_v29 = vmax.f32 %v911_v2, %v282_v27  ;;  %v1042_v30 = vmax.f32 %v916_v3, %v286_v28 }
  0x7b   :  { %363 = vrot.lane.b32.xlu0 %v1032_v26, %s862_s0  ;;  %361 = vrot.lane.b32.xlu1 %v1035_v29, %s862_s0 }
  0x7c   :  { %v288_v31 = vpop.permute.xlu0 %287  ;;  %v290_v32 = vpop.permute.xlu1 %289 }
  0x7d   :  { %v1045_v33 = vmax.f32 %v934_v5, %v288_v31  ;;  %v1052_v34 = vmax.f32 %v939_v6, %v290_v32 }
  0x7f   :  { %365 = vrot.lane.b32.xlu1 %v1042_v30, %s862_s0  ;;  %367 = vrot.lane.b32.xlu0 %v1045_v33, %s862_s0 }
  0x80   :  { %v292_v35 = vpop.permute.xlu0 %291  ;;  %v294_v36 = vpop.permute.xlu1 %293 }
  0x81   :  { %v1055_v37 = vmax.f32 %v960_v13, %v292_v35  ;;  %v1062_v38 = vmax.f32 %v965_v14, %v294_v36 }
  0x83   :  { %369 = vrot.lane.b32.xlu1 %v1052_v34, %s862_s0  ;;  %371 = vrot.lane.b32.xlu0 %v1055_v37, %s862_s0 }
  0x84   :  { %v296_v39 = vpop.permute.xlu0 %295  ;;  %v298_v40 = vpop.permute.xlu1 %297 }
  0x85   :  { %v1065_v41 = vmax.f32 %v923_v4, %v296_v39  ;;  %v1072_v42 = vmax.f32 %v977_v16, %v298_v40 }
  0x87   :  { %373 = vrot.lane.b32.xlu1 %v1062_v38, %s862_s0  ;;  %375 = vrot.lane.b32.xlu0 %v1065_v41, %s862_s0 }
  0x88   :  { %v300_v43 = vpop.permute.xlu0 %299  ;;  %v302_v44 = vpop.permute.xlu1 %301 }
  0x89   :  { %v1074_v45 = vmax.f32 %v63_v17, %v300_v43  ;;  %v1080_v46 = vmax.f32 %v64_v18, %v302_v44 }
  0x8b   :  { %377 = vrot.lane.b32.xlu1 %v1072_v42, %s862_s0  ;;  %379 = vrot.lane.b32.xlu0 %v1074_v45, %s862_s0 }
  0x8c   :  { %v304_v47 = vpop.permute.xlu0 %303  ;;  %v306_v48 = vpop.permute.xlu1 %305 }
  0x8d   :  { %v1082_v49 = vmax.f32 %v65_v19, %v304_v47  ;;  %v1088_v50 = vmax.f32 %v66_v20, %v306_v48 }
  0x8f   :  { %381 = vrot.lane.b32.xlu1 %v1080_v46, %s862_s0  ;;  %383 = vrot.lane.b32.xlu0 %v1082_v49, %s862_s0 }
  0x90   :  { %v308_v51 = vpop.permute.xlu0 %307  ;;  %v310_v52 = vpop.permute.xlu1 %309 }
  0x91   :  { %v1090_v53 = vmax.f32 %v67_v21, %v308_v51  ;;  %v1096_v54 = vmax.f32 %v68_v22, %v310_v52 }
  0x93   :  { %385 = vrot.lane.b32.xlu1 %v1088_v50, %s862_s0  ;;  %387 = vrot.lane.b32.xlu0 %v1090_v53, %s862_s0 }
  0x97   :  { %389 = vrot.lane.b32.xlu1 %v1096_v54, %s862_s0 }
  0xe4   :  { %v822_v56 = vpop.f32.mrb[0].mxu0  ;;  %v834_v57 = vpop.f32.mrb[0].mxu1 }
  0xe5   :  { %v206_v59 = vadd.f32 %v822_v56, %v1103_v55  ;;  %v200_v60 = vpop.f32.mrb[1].mxu0  ;;  %v246_v61 = vadd.f32 %v834_v57, %v1103_v55  ;;  %v1108_v0 = vpop.f32.mrb[1].mxu1 }
  0xe6   :  { %v201_v63 = vadd.f32 %v1103_v55, %v200_v60 }
  0xe7   :  { %425 = vst.msk [vmem:[%s1436_s3 + $0x8] sm:$0xff] %vm423_vm2, %v206_v59  ;;  %v530_v1 = vsel %vm423_vm2, %v206_v59, 0.0  ;;  %v617_v2 = vmul.f32 %v206_v59, %v206_v59  ;;  %433 = vst.msk [vmem:[%s1436_s3 + $0x48] sm:$0xff] %vm423_vm2, %v246_v61  ;;  %v1120_v3 = vsel %vm423_vm2, %v246_v61, 0.0  ;;  %v625_v4 = vmul.f32 %v246_v61, %v246_v61 }
  0xe8   :  { %424 = vst.msk [vmem:[%s1436_s3] sm:$0xff] %vm423_vm2, %v201_v63  ;;  %v529_v7 = vsel %vm423_vm2, %v201_v63, 0.0  ;;  %v616_v8 = vmul.f32 %v201_v63, %v201_v63  ;;  %v825_v9 = vpop.f32.mrb[2].mxu0  ;;  %v1129_v10 = vpop.f32.mrb[2].mxu1 }
  0xe9   :  { %v360_v58 = vpop.permute.xlu0 %359  ;;  %v633_v13 = vsel %vm423_vm2, %v617_v2, 0.0  ;;  %v531_v14 = vadd.f32 %v530_v1, %v529_v7  ;;  %v216_v15 = vadd.f32 %v825_v9, %v1103_v55  ;;  %v1134_v16 = vsel %vm423_vm2, %v625_v4, 0.0  ;;  %v210_v21 = vpop.f32.mrb[3].mxu0 }
  0xea   :  { %v407_v62 = vmax.f32 %v327_v25, %v360_v58  ;;  %v632_v20 = vsel %vm423_vm2, %v616_v8, 0.0  ;;  %v1140_v22 = vpop.f32.mrb[3].mxu1  ;;  %v211_v27 = vadd.f32 %v1103_v55, %v210_v21 }
  0xeb   :  { %v634_v23 = vadd.f32 %v633_v13, %v632_v20  ;;  %427 = vst.msk [vmem:[%s1436_s3 + $0x18] sm:$0xff] %vm423_vm2, %v216_v15  ;;  %v1147_v24 = vsel %vm423_vm2, %v216_v15, 0.0  ;;  %v619_v25 = vmul.f32 %v216_v15, %v216_v15 }
  0xec   :  { %v571_v5 = vsel %vm570_vm3, %v407_v62, 0.0  ;;  %v672_v6 = vmul.f32 %v407_v62, %v407_v62  ;;  %456 = vrot.lane.b32.xlu0 %v407_v62, %s861_s22  ;;  %v828_v32 = vpop.f32.mrb[4].mxu0  ;;  %v1154_v35 = vpop.f32.mrb[4].mxu1  ;;  %426 = vst.msk [vmem:[%s1436_s3 + $0x10] sm:$0xff] %vm423_vm2, %v211_v27  ;;  %v532_v44 = vsel %vm423_vm2, %v211_v27, 0.0  ;;  %v618_v47 = vmul.f32 %v211_v27, %v211_v27 }
  0xed   :  { %v362_v11 = vpop.permute.xlu1 %361  ;;  %v364_v12 = vpop.permute.xlu0 %363  ;;  %v1157_v43 = vsel %vm423_vm2, %v619_v25, 0.0  ;;  %v533_v61 = vadd.f32 %v532_v44, %v531_v14 }
  0xee   :  { %v688_v17 = vsel %vm570_vm3, %v672_v6, 0.0  ;;  %v408_v18 = vmax.f32 %v1035_v29, %v362_v11  ;;  %v409_v19 = vmax.f32 %v1032_v26, %v364_v12  ;;  %v220_v57 = vpop.f32.mrb[5].mxu0  ;;  %v1168_v58 = vpop.f32.mrb[5].mxu1  ;;  %v635_v62 = vsel %vm423_vm2, %v618_v47, 0.0 }
  0xef   :  { %v636_v9 = vadd.f32 %v635_v62, %v634_v23  ;;  %v226_v11 = vadd.f32 %v828_v32, %v1103_v55 }
  0xf0   :  { %v572_v28 = vsel %vm570_vm3, %v408_v18, 0.0  ;;  %v673_v26 = vmul.f32 %v408_v18, %v408_v18  ;;  %v574_v29 = vsel %vm570_vm3, %v409_v19, 0.0  ;;  %v674_v31 = vmul.f32 %v409_v19, %v409_v19  ;;  %458 = vrot.lane.b32.xlu1 %v408_v18, %s861_s22  ;;  %460 = vrot.lane.b32.xlu0 %v409_v19, %s861_s22 }
  0xf1   :  { %v573_v36 = vadd.f32 %v572_v28, %v571_v5  ;;  %v366_v39 = vpop.permute.xlu1 %365  ;;  %v368_v40 = vpop.permute.xlu0 %367  ;;  %429 = vst.msk [vmem:[%s1436_s3 + $0x28] sm:$0xff] %vm423_vm2, %v226_v11  ;;  %v1193_v21 = vsel %vm423_vm2, %v226_v11, 0.0  ;;  %v621_v23 = vmul.f32 %v226_v11, %v226_v11  ;;  %v638_v11 = vadd.f32 %v1157_v43, %v636_v9 }
  0xf2   :  { %v689_v48 = vsel %vm570_vm3, %v673_v26, 0.0  ;;  %v691_v51 = vsel %vm570_vm3, %v674_v31, 0.0  ;;  %v410_v52 = vmax.f32 %v1042_v30, %v366_v39  ;;  %v411_v56 = vmax.f32 %v1045_v33, %v368_v40  ;;  %v1175_v30 = vpop.f32.mrb[6].mxu0  ;;  %v1177_v33 = vpop.f32.mrb[6].mxu1 }
  0xf3   :  { %v690_v59 = vadd.f32 %v689_v48, %v688_v17  ;;  %v575_v60 = vadd.f32 %v574_v29, %v573_v36  ;;  %v1184_v17 = vpop.f32.mrb[7].mxu0  ;;  %v1186_v18 = vpop.f32.mrb[7].mxu1  ;;  %v1200_v32 = vsel %vm423_vm2, %v621_v23, 0.0  ;;  %v221_v36 = vadd.f32 %v1103_v55, %v220_v57 }
  0xf4   :  { %v576_v63 = vsel %vm570_vm3, %v410_v52, 0.0  ;;  %v675_v1 = vmul.f32 %v410_v52, %v410_v52  ;;  %v578_v2 = vsel %vm570_vm3, %v411_v56, 0.0  ;;  %v676_v4 = vmul.f32 %v411_v56, %v411_v56  ;;  %462 = vrot.lane.b32.xlu1 %v410_v52, %s861_s22  ;;  %464 = vrot.lane.b32.xlu0 %v411_v56, %s861_s22 }
  0xf5   :  { %v692_v5 = vadd.f32 %v691_v51, %v690_v59  ;;  %v577_v6 = vadd.f32 %v576_v63, %v575_v60  ;;  %v370_v7 = vpop.permute.xlu1 %369  ;;  %v372_v8 = vpop.permute.xlu0 %371  ;;  %428 = vst.msk [vmem:[%s1436_s3 + $0x20] sm:$0xff] %vm423_vm2, %v221_v36  ;;  %v535_v52 = vadd.f32 %v1147_v24, %v533_v61  ;;  %v536_v56 = vsel %vm423_vm2, %v221_v36, 0.0 }
  0xf6   :  { %v693_v12 = vsel %vm570_vm3, %v675_v1, 0.0  ;;  %v695_v13 = vsel %vm570_vm3, %v676_v4, 0.0  ;;  %v412_v14 = vmax.f32 %v1052_v34, %v370_v7  ;;  %v413_v15 = vmax.f32 %v1055_v37, %v372_v8 }
  0xf7   :  { %v694_v19 = vadd.f32 %v693_v12, %v692_v5  ;;  %v579_v20 = vadd.f32 %v578_v2, %v577_v6  ;;  %v537_v2 = vadd.f32 %v536_v56, %v535_v52  ;;  %v620_v4 = vmul.f32 %v221_v36, %v221_v36 }
  0xf8   :  { %v580_v25 = vsel %vm570_vm3, %v412_v14, 0.0  ;;  %v677_v34 = vmul.f32 %v412_v14, %v412_v14  ;;  %v582_v37 = vsel %vm570_vm3, %v413_v15, 0.0  ;;  %v678_v27 = vmul.f32 %v413_v15, %v413_v15  ;;  %466 = vrot.lane.b32.xlu1 %v412_v14, %s861_s22  ;;  %468 = vrot.lane.b32.xlu0 %v413_v15, %s861_s22 }
  0xf9   :  { %v696_v28 = vadd.f32 %v695_v13, %v694_v19  ;;  %v581_v26 = vadd.f32 %v580_v25, %v579_v20  ;;  %v374_v29 = vpop.permute.xlu1 %373  ;;  %v376_v31 = vpop.permute.xlu0 %375  ;;  %v639_v12 = vsel %vm423_vm2, %v620_v4, 0.0  ;;  %v236_v43 = vadd.f32 %v1175_v30, %v1103_v55 }
  0xfa   :  { %v697_v39 = vsel %vm570_vm3, %v677_v34, 0.0  ;;  %v699_v40 = vsel %vm570_vm3, %v678_v27, 0.0  ;;  %v414_v44 = vmax.f32 %v1062_v38, %v374_v29  ;;  %v415_v47 = vmax.f32 %v1065_v41, %v376_v31 }
  0xfb   :  { %v698_v48 = vadd.f32 %v697_v39, %v696_v28  ;;  %v583_v51 = vadd.f32 %v582_v37, %v581_v26  ;;  %v640_v25 = vadd.f32 %v639_v12, %v638_v11  ;;  %431 = vst.msk [vmem:[%s1436_s3 + $0x38] sm:$0xff] %vm423_vm2, %v236_v43  ;;  %v542_v29 = vsel %vm423_vm2, %v236_v43, 0.0 }
  0xfc   :  { %v584_v57 = vsel %vm570_vm3, %v414_v44, 0.0  ;;  %v679_v59 = vmul.f32 %v414_v44, %v414_v44  ;;  %v586_v60 = vsel %vm570_vm3, %v415_v47, 0.0  ;;  %v680_v62 = vmul.f32 %v415_v47, %v415_v47  ;;  %470 = vrot.lane.b32.xlu1 %v414_v44, %s861_s22  ;;  %472 = vrot.lane.b32.xlu0 %v415_v47, %s861_s22 }
  0xfd   :  { %v700_v38 = vadd.f32 %v699_v40, %v698_v48  ;;  %v585_v41 = vadd.f32 %v584_v57, %v583_v51  ;;  %v378_v63 = vpop.permute.xlu1 %377  ;;  %v380_v1 = vpop.permute.xlu0 %379  ;;  %v623_v31 = vmul.f32 %v236_v43, %v236_v43  ;;  %v231_v51 = vadd.f32 %v1103_v55, %v1184_v17 }
  0xfe   :  { %v701_v24 = vsel %vm570_vm3, %v679_v59, 0.0  ;;  %v703_v61 = vsel %vm570_vm3, %v680_v62, 0.0  ;;  %v416_v5 = vmax.f32 %v1072_v42, %v378_v63  ;;  %v417_v6 = vmax.f32 %v1074_v45, %v380_v1 }
  0xff   :  { %v702_v7 = vadd.f32 %v701_v24, %v700_v38  ;;  %v587_v8 = vadd.f32 %v586_v60, %v585_v41  ;;  %v645_v48 = vsel %vm423_vm2, %v623_v31, 0.0  ;;  %430 = vst.msk [vmem:[%s1436_s3 + $0x30] sm:$0xff] %vm423_vm2, %v231_v51  ;;  %v539_v38 = vadd.f32 %v1193_v21, %v537_v2 }
 0x100   :  { %v588_v13 = vsel %vm570_vm3, %v416_v5, 0.0  ;;  %v681_v14 = vmul.f32 %v416_v5, %v416_v5  ;;  %v590_v15 = vsel %vm570_vm3, %v417_v6, 0.0  ;;  %v682_v19 = vmul.f32 %v417_v6, %v417_v6  ;;  %474 = vrot.lane.b32.xlu1 %v416_v5, %s861_s22  ;;  %476 = vrot.lane.b32.xlu0 %v417_v6, %s861_s22 }
 0x101   :  { %v704_v20 = vadd.f32 %v703_v61, %v702_v7  ;;  %v589_v42 = vadd.f32 %v588_v13, %v587_v8  ;;  %v382_v23 = vpop.permute.xlu1 %381  ;;  %v384_v45 = vpop.permute.xlu0 %383  ;;  %v540_v17 = vsel %vm423_vm2, %v231_v51, 0.0  ;;  %v622_v5 = vmul.f32 %v231_v51, %v231_v51 }
 0x102   :  { %v705_v9 = vsel %vm570_vm3, %v681_v14, 0.0  ;;  %v707_v34 = vsel %vm570_vm3, %v682_v19, 0.0  ;;  %v418_v37 = vmax.f32 %v1080_v46, %v382_v23  ;;  %v419_v27 = vmax.f32 %v1082_v49, %v384_v45 }
 0x103   :  { %v706_v28 = vadd.f32 %v705_v9, %v704_v20  ;;  %v591_v26 = vadd.f32 %v590_v15, %v589_v42  ;;  %v541_v61 = vadd.f32 %v540_v17, %v539_v38  ;;  %v642_v7 = vadd.f32 %v1200_v32, %v640_v25 }
 0x104   :  { %v592_v30 = vsel %vm570_vm3, %v418_v37, 0.0  ;;  %v683_v36 = vmul.f32 %v418_v37, %v418_v37  ;;  %v594_v39 = vsel %vm570_vm3, %v419_v27, 0.0  ;;  %v684_v40 = vmul.f32 %v419_v27, %v419_v27  ;;  %478 = vrot.lane.b32.xlu1 %v418_v37, %s861_s22  ;;  %480 = vrot.lane.b32.xlu0 %v419_v27, %s861_s22 }
 0x105   :  { %v708_v46 = vadd.f32 %v707_v34, %v706_v28  ;;  %v593_v49 = vadd.f32 %v592_v30, %v591_v26  ;;  %v386_v44 = vpop.permute.xlu1 %385  ;;  %v388_v47 = vpop.permute.xlu0 %387  ;;  %v643_v12 = vsel %vm423_vm2, %v622_v5, 0.0  ;;  %v241_v13 = vadd.f32 %v1103_v55, %v1108_v0 }
 0x106   :  { %v709_v52 = vsel %vm570_vm3, %v683_v36, 0.0  ;;  %v711_v56 = vsel %vm570_vm3, %v684_v40, 0.0  ;;  %v420_v57 = vmax.f32 %v1088_v50, %v386_v44  ;;  %v1249_v59 = vmax.f32 %v1090_v53, %v388_v47 }
 0x107   :  { %v710_v60 = vadd.f32 %v709_v52, %v708_v46  ;;  %v595_v62 = vadd.f32 %v594_v39, %v593_v49  ;;  %v644_v19 = vadd.f32 %v643_v12, %v642_v7  ;;  %v543_v20 = vadd.f32 %v542_v29, %v541_v61  ;;  %432 = vst.msk [vmem:[%s1436_s3 + $0x40] sm:$0xff] %vm423_vm2, %v241_v13 }
 0x108   :  { %v596_v41 = vsel %vm570_vm3, %v420_v57, 0.0  ;;  %v685_v63 = vmul.f32 %v420_v57, %v420_v57  ;;  %v598_v50 = vsel %vm570_vm3, %v1249_v59, 0.0  ;;  %v686_v53 = vmul.f32 %v1249_v59, %v1249_v59  ;;  %482 = vrot.lane.b32.xlu1 %v420_v57, %s861_s22 }
 0x109   :  { %v712_v1 = vadd.f32 %v711_v56, %v710_v60  ;;  %v597_v4 = vadd.f32 %v596_v41, %v595_v62  ;;  %v390_v24 = vpop.permute.xlu1 %389  ;;  %v544_v32 = vsel %vm423_vm2, %v241_v13, 0.0  ;;  %v624_v23 = vmul.f32 %v241_v13, %v241_v13 }
 0x10a   :  { %v713_v21 = vsel %vm570_vm3, %v685_v63, 0.0  ;;  %v715_v2 = vsel %vm570_vm3, %v686_v53, 0.0  ;;  %v1266_v6 = vmax.f32 %v1096_v54, %v390_v24  ;;  %v545_v45 = vadd.f32 %v544_v32, %v543_v20 }
 0x10b   :  { %v714_v8 = vadd.f32 %v713_v21, %v712_v1  ;;  %v599_v11 = vadd.f32 %v598_v50, %v597_v4  ;;  %v646_v25 = vadd.f32 %v645_v48, %v644_v19  ;;  %v256_v43 = vadd.f32 %v1129_v10, %v1103_v55 }
 0x10c   :  { %v600_v14 = vsel %vm570_vm3, %v1266_v6, 0.0  ;;  %v687_v15 = vmul.f32 %v1266_v6, %v1266_v6  ;;  %v647_v37 = vsel %vm423_vm2, %v624_v23, 0.0  ;;  %v251_v27 = vadd.f32 %v1103_v55, %v1140_v22 }
 0x10d   :  { %v716_v42 = vadd.f32 %v715_v2, %v714_v8  ;;  %v601_v54 = vadd.f32 %v600_v14, %v599_v11  ;;  %v648_v28 = vadd.f32 %v647_v37, %v646_v25  ;;  %435 = vst.msk [vmem:[%s1436_s3 + $0x58] sm:$0xff] %vm423_vm2, %v256_v43  ;;  %v550_v26 = vsel %vm423_vm2, %v256_v43, 0.0 }
 0x10e   :  { %v717_v0 = vsel %vm570_vm3, %v687_v15, 0.0  ;;  %v627_v29 = vmul.f32 %v256_v43, %v256_v43  ;;  %v547_v31 = vadd.f32 %v1120_v3, %v545_v45  ;;  %434 = vst.msk [vmem:[%s1436_s3 + $0x50] sm:$0xff] %vm423_vm2, %v251_v27  ;;  %v548_v22 = vsel %vm423_vm2, %v251_v27, 0.0 }
 0x10f   :  { %v602_v9 = vrot.slane %v601_v54, 4  ;;  %v718_v34 = vadd.f32 %v717_v0, %v716_v42  ;;  %v626_v36 = vmul.f32 %v251_v27, %v251_v27  ;;  %v650_v46 = vadd.f32 %v1134_v16, %v648_v28 }
 0x110   :  { %v653_v39 = vsel %vm423_vm2, %v627_v29, 0.0  ;;  %v549_v40 = vadd.f32 %v548_v22, %v547_v31  ;;  %v266_v49 = vadd.f32 %v1154_v35, %v1103_v55  ;;  %v261_v48 = vadd.f32 %v1103_v55, %v1168_v58 }
 0x111   :  { %v603_v30 = vadd.f32 %v602_v9, %v601_v54  ;;  %v719_v10 = vrot.slane %v718_v34, 4  ;;  %v651_v47 = vsel %vm423_vm2, %v626_v36, 0.0  ;;  %v276_v41 = vadd.f32 %v1177_v33, %v1103_v55 }
 0x112   :  { %v652_v51 = vadd.f32 %v651_v47, %v650_v46  ;;  %437 = vst.msk [vmem:[%s1436_s3 + $0x68] sm:$0xff] %vm423_vm2, %v266_v49  ;;  %v554_v52 = vsel %vm423_vm2, %v266_v49, 0.0  ;;  %v629_v56 = vmul.f32 %v266_v49, %v266_v49  ;;  %v551_v16 = vadd.f32 %v550_v26, %v549_v40  ;;  %436 = vst.msk [vmem:[%s1436_s3 + $0x60] sm:$0xff] %vm423_vm2, %v261_v48 }
 0x113   :  { %v604_v44 = vrot.slane %v603_v30, 2  ;;  %v720_v3 = vadd.f32 %v719_v10, %v718_v34  ;;  %v552_v35 = vsel %vm423_vm2, %v261_v48, 0.0  ;;  %v628_v58 = vmul.f32 %v261_v48, %v261_v48  ;;  %439 = vst.msk [vmem:[%s1436_s3 + $0x78] sm:$0xff] %vm423_vm2, %v276_v41 }
 0x114   :  { %v657_v62 = vsel %vm423_vm2, %v629_v56, 0.0  ;;  %v553_v38 = vadd.f32 %v552_v35, %v551_v16  ;;  %v654_v17 = vadd.f32 %v653_v39, %v652_v51  ;;  %v271_v1 = vadd.f32 %v1103_v55, %v1186_v18 }
 0x115   :  { %v605_v57 = vadd.f32 %v604_v44, %v603_v30  ;;  %v721_v60 = vrot.slane %v720_v3, 2  ;;  %v655_v53 = vsel %vm423_vm2, %v628_v58, 0.0  ;;  %v558_v24 = vsel %vm423_vm2, %v276_v41, 0.0 }
 0x116   :  { %v656_v4 = vadd.f32 %v655_v53, %v654_v17  ;;  %v631_v61 = vmul.f32 %v276_v41, %v276_v41  ;;  %v555_v5 = vadd.f32 %v554_v52, %v553_v38  ;;  %438 = vst.msk [vmem:[%s1436_s3 + $0x70] sm:$0xff] %vm423_vm2, %v271_v1  ;;  %v556_v33 = vsel %vm423_vm2, %v271_v1, 0.0 }
 0x117   :  { %v606_v63 = vrot.slane %v605_v57, 1  ;;  %v722_v50 = vadd.f32 %v721_v60, %v720_v3  ;;  %v630_v55 = vmul.f32 %v271_v1, %v271_v1  ;;  %v863_v15 = vmov 0.0  }
 0x118   :  { %v557_v18 = vadd.f32 %v556_v33, %v555_v5  ;;  %v658_v7 = vadd.f32 %v657_v62, %v656_v4  ;;  %v661_v11 = vsel %vm423_vm2, %v631_v61, 0.0  ;;  %526 = vst.msk [vmem:[%s1437_s4] sm:$0xff] %vm525_vm4, %v863_v15  ;;  %527 = vst.msk [vmem:[%s1438_s5] sm:$0xff] %vm525_vm4, %v863_v15 }
 0x119   :  { %v607_v21 = vadd.f32 %v606_v63, %v605_v57  ;;  %v723_v2 = vrot.slane %v722_v50, 1  ;;  %v659_v12 = vsel %vm423_vm2, %v630_v55, 0.0 }
 0x11a   :  { %v559_v13 = vadd.f32 %v558_v24, %v557_v18  ;;  %v660_v14 = vadd.f32 %v659_v12, %v658_v7 }
 0x11b   :  { %609 = vrot.lane.b32.xlu0 %v607_v21, %s861_s22  ;;  %v724_v8 = vadd.f32 %v723_v2, %v722_v50 }
 0x11c   :  { %v560_v19 = vrot.slane %v559_v13, 4  ;;  %v662_v20 = vadd.f32 %v661_v11, %v660_v14 }
 0x11d   :  { %726 = vrot.lane.b32.xlu1 %v724_v8, %s861_s22 }
 0x11e   :  { %v561_v42 = vadd.f32 %v560_v19, %v559_v13  ;;  %v663_v54 = vrot.slane %v662_v20, 4 }
 0x11f   :  { %484 = vrot.lane.b32.xlu0 %v1249_v59, %s861_s22  ;;  %v528_v9 = vld [vmem:[%s1437_s4] sm:$0x1] }
 0x120   :  { %v562_v32 = vrot.slane %v561_v42, 2  ;;  %v664_v23 = vadd.f32 %v663_v54, %v662_v20  ;;  %v615_v59 = vld [vmem:[%s1438_s5] sm:$0x1] }
 0x121   :  { %486 = vrot.lane.b32.xlu1 %v1266_v6, %s861_s22 }
 0x122   :  { %v563_v0 = vadd.f32 %v562_v32, %v561_v42  ;;  %v665_v45 = vrot.slane %v664_v23, 2 }
 0x124   :  { %v564_v25 = vrot.slane %v563_v0, 1  ;;  %v666_v43 = vadd.f32 %v665_v45, %v664_v23 }
 0x126   :  { %v565_v34 = vadd.f32 %v564_v25, %v563_v0  ;;  %v667_v37 = vrot.slane %v666_v43, 1 }
 0x128   :  { %v668_v27 = vadd.f32 %v667_v37, %v666_v43  ;;  %v566_v28 = vadd.f32 %v565_v34, %v528_v9 }
 0x12a   :  { %568 = vst.msk [vmem:[%s1437_s4] sm:$0x1] %vm567_vm5, %v566_v28  ;;  %v669_v6 = vadd.f32 %v668_v27, %v615_v59 }
 0x12c   :  { %670 = vst.msk [vmem:[%s1438_s5] sm:$0x1] %vm567_vm5, %v669_v6 }
 0x131   :  { %v569_v51 = vld [vmem:[%s1437_s4] sm:$0x1] }
 0x133   :  { %v671_v16 = vld [vmem:[%s1438_s5] sm:$0x1] }
 0x15e   :  { %v457_v26 = vpop.permute.xlu0 %456 }
 0x15f   :  { %505 = vst.msk [vmem:[%s1436_s3] sm:$0xff] %vm504_vm6, %v457_v26 }
 0x162   :  { %v459_v29 = vpop.permute.xlu1 %458  ;;  %v461_v31 = vpop.permute.xlu0 %460 }
 0x163   :  { %506 = vst.msk [vmem:[%s1436_s3 + $0x8] sm:$0xff] %vm504_vm6, %v459_v29  ;;  %507 = vst.msk [vmem:[%s1436_s3 + $0x10] sm:$0xff] %vm504_vm6, %v461_v31 }
 0x166   :  { %v463_v30 = vpop.permute.xlu1 %462  ;;  %v465_v10 = vpop.permute.xlu0 %464 }
 0x167   :  { %508 = vst.msk [vmem:[%s1436_s3 + $0x18] sm:$0xff] %vm504_vm6, %v463_v30  ;;  %509 = vst.msk [vmem:[%s1436_s3 + $0x20] sm:$0xff] %vm504_vm6, %v465_v10 }
 0x16a   :  { %v467_v22 = vpop.permute.xlu1 %466  ;;  %v469_v36 = vpop.permute.xlu0 %468 }
 0x16b   :  { %510 = vst.msk [vmem:[%s1436_s3 + $0x28] sm:$0xff] %vm504_vm6, %v467_v22  ;;  %511 = vst.msk [vmem:[%s1436_s3 + $0x30] sm:$0xff] %vm504_vm6, %v469_v36 }
 0x16e   :  { %v471_v39 = vpop.permute.xlu1 %470  ;;  %v473_v40 = vpop.permute.xlu0 %472 }
 0x16f   :  { %512 = vst.msk [vmem:[%s1436_s3 + $0x38] sm:$0xff] %vm504_vm6, %v471_v39  ;;  %513 = vst.msk [vmem:[%s1436_s3 + $0x40] sm:$0xff] %vm504_vm6, %v473_v40 }
 0x172   :  { %v475_v46 = vpop.permute.xlu1 %474  ;;  %v477_v49 = vpop.permute.xlu0 %476 }
 0x173   :  { %514 = vst.msk [vmem:[%s1436_s3 + $0x48] sm:$0xff] %vm504_vm6, %v475_v46  ;;  %515 = vst.msk [vmem:[%s1436_s3 + $0x50] sm:$0xff] %vm504_vm6, %v477_v49 }
 0x176   :  { %v479_v44 = vpop.permute.xlu1 %478  ;;  %v481_v3 = vpop.permute.xlu0 %480 }
 0x177   :  { %516 = vst.msk [vmem:[%s1436_s3 + $0x58] sm:$0xff] %vm504_vm6, %v479_v44  ;;  %517 = vst.msk [vmem:[%s1436_s3 + $0x60] sm:$0xff] %vm504_vm6, %v481_v3 }
 0x17a   :  { %v483_v47 = vpop.permute.xlu1 %482 }
 0x17b   :  { %518 = vst.msk [vmem:[%s1436_s3 + $0x68] sm:$0xff] %vm504_vm6, %v483_v47 }
 0x18d   :  { %v610_v48 = vpop.permute.xlu0 %609 }
 0x18e   :  { %v612_v52 = vadd.f32 %v610_v48, %v569_v51 }
 0x18f   :  { %v727_v56 = vpop.permute.xlu1 %726 }
 0x190   :  { %614 = vst.msk [vmem:[%s1437_s4] sm:$0x1] %vm613_vm7, %v612_v52  ;;  %v729_v57 = vadd.f32 %v727_v56, %v671_v16 }
 0x191   :  { %v485_v60 = vpop.permute.xlu0 %484 }
 0x192   :  { %730 = vst.msk [vmem:[%s1438_s5] sm:$0x1] %vm613_vm7, %v729_v57 }
 0x193   :  { %519 = vst.msk [vmem:[%s1436_s3 + $0x70] sm:$0xff] %vm504_vm6, %v485_v60  ;;  %v487_v35 = vpop.permute.xlu1 %486 }
 0x194   :  { %520 = vst.msk [vmem:[%s1436_s3 + $0x78] sm:$0xff] %vm504_vm6, %v487_v35 }

</bundles_post_ra>
